<compile_context>
chip_gen: v7x
topology: tpu7x:2x2x1
jax: 0.10.0
libtpu: 0.0.40
codegen_flags: <defaults>
</compile_context>

<pallas_src>
import math
from functools import reduce

import jax
import jax.numpy as jnp
from jax import lax
from jax.experimental import pallas as pl
from jax.experimental.pallas import tpu as pltpu

_LANE = 128  # vreg lane width — intermediate feature dims padded to this


def _round_up(n: int, m: int) -> int:
    return ((n + m - 1) // m) * m


def _make_mlp_kernel(num_layers: int, use_bias: bool, out_features: int):
    """Kernel computing a chain of `num_layers` linear layers.

    Kernel refs: x_ref, w0[, b0], w1[, b1], ..., o_ref
    with wi already transposed+padded to (in_p, out_p) and bi as (1, out_p).
    The last layer's padded result is sliced to `out_features` columns at the
    store (padded weight/bias entries are zero, so this is exact).
    """

    def kernel(*refs):
        x_ref = refs[0]
        o_ref = refs[-1]
        params = refs[1:-1]

        compute_dtype = x_ref.dtype
        h = x_ref[...]                      # native dtype, no upcast
        idx = 0
        for layer in range(num_layers):
            w = params[idx][...]            # (in_p, out_p), native dtype
            idx += 1
            # Plain h @ W on the MXU with f32 accumulate.
            h = lax.dot_general(h, w, (((1,), (0,)), ((), ())),
                                preferred_element_type=jnp.float32)
            if use_bias:
                h = h + params[idx][...]    # (1, out_p) broadcast; padding is 0
                idx += 1
            # Keep subsequent matmuls on the fast low-precision MXU path.
            if layer + 1 < num_layers and compute_dtype != jnp.float32:
                h = h.astype(compute_dtype)
        # Store only the valid (unpadded) output columns.
        o_ref[...] = h[:, :out_features].astype(o_ref.dtype)

    return kernel


def prepare_params(weights, biases, dtype=None):
    """One-time prep: transpose PyTorch (out, in) weights to (in, out) and
    zero-pad feature dims to 128-lane multiples.

    The FIRST layer's in-dim is left unpadded so x can enter the kernel
    unpadded; every other in/out dim is lane-padded (zero padding is exact
    for matmul + bias).  Optionally casts params once to `dtype` (e.g. bf16
    for the v6e/v7x MXU fast path) — off by default.
    """
    use_bias = biases is not None
    prepped_w, prepped_b = [], []
    for i, w in enumerate(weights):
        out_f, in_f = w.shape                     # PyTorch (out, in)
        in_p = in_f if i == 0 else _round_up(in_f, _LANE)
        out_p = _round_up(out_f, _LANE)
        wt = jnp.pad(w.T, ((0, in_p - in_f), (0, out_p - out_f)))
        if dtype is not None:
            wt = wt.astype(dtype)
        prepped_w.append(wt)
        if use_bias:
            b = jnp.pad(biases[i], (0, out_p - out_f)).reshape(1, out_p)
            if dtype is not None:
                b = b.astype(dtype)
            prepped_b.append(b)
    return prepped_w, (prepped_b if use_bias else None)


def model_forward(x, prepped_weights, prepped_biases, out_features, *,
                  block_batch=256):
    """Runs the linear-layer chain inside a single Pallas kernel.

    Args:
      x:                (batch, in_features) activations — UNPADDED.
      prepped_weights:  list of (in_p, out_p) transposed+padded weights.
      prepped_biases:   list of (1, out_p) padded biases, or None.
      out_features:     true (unpadded) output feature count of the last layer.
      block_batch:      batch tile size used once batch >= 2 * block_batch.
    """
    use_bias = prepped_biases is not None
    num_layers = len(prepped_weights)
    assert num_layers >= 1
    batch, in_f = x.shape
    assert prepped_weights[0].shape[0] == in_f, "x feature dim mismatch"

    params = []
    for i in range(num_layers):
        params.append(prepped_weights[i])
        if use_bias:
            params.append(prepped_biases[i])

    # Batch tiling: one full-array block for small batch; 256-row tiles
    # (parallel grid -> both v7x TensorCores, activation double-buffering)
    # for large batch.
    tb = block_batch if batch >= 2 * block_batch else batch
    grid = (pl.cdiv(batch, tb),)

    x_spec = pl.BlockSpec((tb, in_f), lambda i: (i, 0))
    o_spec = pl.BlockSpec((tb, out_features), lambda i: (i, 0))
    # Constant index_map -> weights/biases stay VMEM-resident across tiles.
    param_specs = [pl.BlockSpec(p.shape, lambda i: (0, 0)) for p in params]

    out_shape = jax.ShapeDtypeStruct((batch, out_features), x.dtype)

    # Advisory cost hint so XLA schedules neighboring ops around the call.
    flops = 2 * batch * sum(w.shape[0] * w.shape[1] for w in prepped_weights)
    bytes_accessed = (
        int(x.size) * x.dtype.itemsize
        + sum(int(p.size) * p.dtype.itemsize for p in params)
        + batch * out_features * jnp.dtype(x.dtype).itemsize)
    cost = pl.CostEstimate(flops=flops, transcendentals=0,
                           bytes_accessed=bytes_accessed)

    # Explicit VMEM budget with headroom, clamped to v7x's 64 MiB physical.
    param_bytes = sum(int(p.size) * p.dtype.itemsize for p in params)
    widest = max(w.shape[1] for w in prepped_weights)
    act_bytes = 2 * tb * (in_f + out_features + 2 * widest) * 4
    vmem_needed = int(2 * param_bytes + act_bytes) + (4 << 20)
    # TODO(synk): if all padded weights exceed ~64 MiB (v7x VMEM), stream
    # weights layer-by-layer (pltpu.emit_pipeline) instead of keeping them all
    # resident.
    compiler_params = pltpu.CompilerParams(
        dimension_semantics=("parallel",),
        vmem_limit_bytes=min(max(vmem_needed, 32 << 20), 64 << 20),
    )

    kernel = _make_mlp_kernel(num_layers, use_bias, out_features)

    return pl.pallas_call(
        kernel,
        out_shape=out_shape,
        grid=grid,
        in_specs=[x_spec] + param_specs,
        out_specs=o_spec,
        cost_estimate=cost,
        compiler_params=compiler_params,
    )(x, *params)


def init_linear_params(key, in_features, out_features, bias):
    """Deterministic init mimicking nn.Linear's default (uniform +-1/sqrt(in))."""
    kw, kb = jax.random.split(key)
    bound = 1.0 / math.sqrt(in_features)
    w = jax.random.uniform(kw, (out_features, in_features),
                           minval=-bound, maxval=bound, dtype=jnp.float32)
    b = (jax.random.uniform(kb, (out_features,),
                            minval=-bound, maxval=bound, dtype=jnp.float32)
         if bias else None)
    return w, b


if __name__ == "__main__":
    # Module configuration (synthetic, deterministic, SMALL shapes).
    model_linear_layers_dims = (32, 64, 16)   # two linear layers: 32->64->16
    model_dead_layer_dims = (8, 8)            # one dead layer: unused in forward
    bias = True
    batch = 8   # NOTE: stack calls so batch >= 128/256 for real MXU utilization.

    key = jax.random.PRNGKey(0)
    key, xk = jax.random.split(key)
    x = jax.random.normal(xk, (batch, model_linear_layers_dims[0]),
                          dtype=jnp.float32)

    # Live linear layers (PyTorch (out, in) layout).
    weights, biases = [], []
    for a, b in zip(model_linear_layers_dims[:-1], model_linear_layers_dims[1:]):
        key, lk = jax.random.split(key)
        w, bb = init_linear_params(lk, a, b, bias)
        weights.append(w)
        biases.append(bb)
    biases_arg = biases if bias else None

    # Dead layers: parameters exist but are never used in forward, exactly
    # like the PyTorch module.
    dead_weights = []
    for a, b in zip(model_dead_layer_dims[:-1], model_dead_layer_dims[1:]):
        key, lk = jax.random.split(key)
        w_dead, _ = init_linear_params(lk, a, b, bias=False)
        dead_weights.append(w_dead)

    # One-time param prep (transpose + lane padding) + Pallas forward.
    # (Pass dtype=jnp.bfloat16 here for the v6e/v7x MXU fast path when the
    #  accuracy budget allows; kept f32 to match the reference tolerance.)
    prepped_w, prepped_b = prepare_params(weights, biases_arg, dtype=None)
    out = model_forward(x, prepped_w, prepped_b,
                        out_features=model_linear_layers_dims[-1])
    out = jax.block_until_ready(out)

    # Reference check in plain JAX (y = x @ W^T + b chained, unpadded).
    def ref_forward(x, weights, biases):
        def apply(h, i):
            h = h @ weights[i].T
            if biases is not None:
                h = h + biases[i]
            return h
        return reduce(apply, range(len(weights)), x)

    ref = ref_forward(x, weights, biases_arg)
    assert out.shape == (batch, model_linear_layers_dims[-1])
    assert jnp.allclose(out, ref, atol=1e-5, rtol=1e-5), "mismatch vs reference"

    print("KERNEL_OK")
</pallas_src>

<mosaic_0001>
module attributes {stable_mosaic.version = 11 : i64} {
  func.func @kernel(%arg0: i32, %arg1: memref<8x32xf32, #tpu.memory_space<vmem>>, %arg2: memref<32x128xf32, #tpu.memory_space<vmem>>, %arg3: memref<1x128xf32, #tpu.memory_space<vmem>>, %arg4: memref<128x128xf32, #tpu.memory_space<vmem>>, %arg5: memref<1x128xf32, #tpu.memory_space<vmem>>, %arg6: memref<8x16xf32, #tpu.memory_space<vmem>>) attributes {dimension_semantics = [#tpu.dimension_semantics<parallel>], iteration_bounds = array<i64: 1>, scalar_prefetch = 0 : i64, scratch_operands = 0 : i64, tpu.core_type = #tpu.core_type<tc>, window_params = [{transform_indices = @transform_0, window_bounds = array<i64: 8, 32>}, {pipeline_mode = #tpu.pipeline_mode<synchronous>, transform_indices = @transform_1, window_bounds = array<i64: 32, 128>}, {pipeline_mode = #tpu.pipeline_mode<synchronous>, transform_indices = @transform_2, window_bounds = array<i64: 1, 128>}, {pipeline_mode = #tpu.pipeline_mode<synchronous>, transform_indices = @transform_3, window_bounds = array<i64: 128, 128>}, {pipeline_mode = #tpu.pipeline_mode<synchronous>, transform_indices = @transform_4, window_bounds = array<i64: 1, 128>}, {transform_indices = @transform_5, window_bounds = array<i64: 8, 16>}]} {
    %c0 = arith.constant 0 : index
    %c0_0 = arith.constant 0 : index
    %0 = vector.load %arg1[%c0, %c0_0] : memref<8x32xf32, #tpu.memory_space<vmem>>, vector<8x32xf32>
    %c0_1 = arith.constant 0 : index
    %c0_2 = arith.constant 0 : index
    %1 = vector.load %arg2[%c0_1, %c0_2] : memref<32x128xf32, #tpu.memory_space<vmem>>, vector<32x128xf32>
    %cst = arith.constant dense<0.000000e+00> : vector<8x128xf32>
    %2 = tpu.matmul %0, %1, %cst {dimension_numbers = #tpu.dot_dimension_numbers<[1], [0], [0], [1], [0, 0, 1, 1], [], []>} : vector<8x32xf32>, vector<32x128xf32>, vector<8x128xf32> -> vector<8x128xf32>
    %c0_3 = arith.constant 0 : index
    %c0_4 = arith.constant 0 : index
    %3 = vector.load %arg3[%c0_3, %c0_4] : memref<1x128xf32, #tpu.memory_space<vmem>>, vector<1x128xf32>
    %4 = vector.broadcast %3 : vector<1x128xf32> to vector<8x128xf32>
    %5 = arith.addf %2, %4 : vector<8x128xf32>
    %c0_5 = arith.constant 0 : index
    %c0_6 = arith.constant 0 : index
    %6 = vector.load %arg4[%c0_5, %c0_6] : memref<128x128xf32, #tpu.memory_space<vmem>>, vector<128x128xf32>
    %cst_7 = arith.constant dense<0.000000e+00> : vector<8x128xf32>
    %7 = tpu.matmul %5, %6, %cst_7 {dimension_numbers = #tpu.dot_dimension_numbers<[1], [0], [0], [1], [0, 0, 1, 1], [], []>} : vector<8x128xf32>, vector<128x128xf32>, vector<8x128xf32> -> vector<8x128xf32>
    %c0_8 = arith.constant 0 : index
    %c0_9 = arith.constant 0 : index
    %8 = vector.load %arg5[%c0_8, %c0_9] : memref<1x128xf32, #tpu.memory_space<vmem>>, vector<1x128xf32>
    %9 = vector.broadcast %8 : vector<1x128xf32> to vector<8x128xf32>
    %10 = arith.addf %7, %9 : vector<8x128xf32>
    %11 = vector.extract_strided_slice %10 {offsets = [0, 0], sizes = [8, 16], strides = [1, 1]} : vector<8x128xf32> to vector<8x16xf32>
    %c0_10 = arith.constant 0 : index
    %c0_11 = arith.constant 0 : index
    %12 = vector.load %arg6[%c0_10, %c0_11] : memref<8x16xf32, #tpu.memory_space<vmem>>, vector<8x16xf32>
    tpu.vector_store %arg6[%c0_10, %c0_11], %11 {strides = array<i32>} : memref<8x16xf32, #tpu.memory_space<vmem>>, vector<8x16xf32>,
    return
  }
  func.func @transform_0(%arg0: i32) -> (i32, i32) {
    %c0_i32 = arith.constant 0 : i32
    %c0_i32_0 = arith.constant 0 : i32
    return %arg0, %c0_i32 : i32, i32
  }
  func.func @transform_1(%arg0: i32) -> (i32, i32) {
    %c0_i32 = arith.constant 0 : i32
    %c0_i32_0 = arith.constant 0 : i32
    %c0_i32_1 = arith.constant 0 : i32
    return %c0_i32, %c0_i32_0 : i32, i32
  }
  func.func @transform_2(%arg0: i32) -> (i32, i32) {
    %c0_i32 = arith.constant 0 : i32
    %c0_i32_0 = arith.constant 0 : i32
    %c0_i32_1 = arith.constant 0 : i32
    return %c0_i32, %c0_i32_0 : i32, i32
  }
  func.func @transform_3(%arg0: i32) -> (i32, i32) {
    %c0_i32 = arith.constant 0 : i32
    %c0_i32_0 = arith.constant 0 : i32
    %c0_i32_1 = arith.constant 0 : i32
    return %c0_i32, %c0_i32_0 : i32, i32
  }
  func.func @transform_4(%arg0: i32) -> (i32, i32) {
    %c0_i32 = arith.constant 0 : i32
    %c0_i32_0 = arith.constant 0 : i32
    %c0_i32_1 = arith.constant 0 : i32
    return %c0_i32, %c0_i32_0 : i32, i32
  }
  func.func @transform_5(%arg0: i32) -> (i32, i32) {
    %c0_i32 = arith.constant 0 : i32
    %c0_i32_0 = arith.constant 0 : i32
    return %arg0, %c0_i32 : i32, i32
  }
}

</mosaic_0001>

<bundles_post_ra>
// kernel: tpu_custom_call.1
= control target key start
LH: loop header
LB: loop body
LE: loop exit
PB: predicated region body
PF: predicated region fallthrough
CT: control target
= control target key end

     0   :  { %10 = vsyncpa [#allocation3], 0  ;;  %s560_s0 = inlined_call_operand.hbm [shape: f32[8,32], index: 0, kind: input, shape index: {}]   ;;  %s561_s1 = inlined_call_operand.hbm [shape: f32[32,128], index: 1, kind: input, shape index: {}]   ;;  %s562_s2 = inlined_call_operand.vmem [shape: f32[1,128], index: 2, kind: input, shape index: {}]   ;;  %s563_s3 = inlined_call_operand.hbm [shape: f32[128,128], index: 3, kind: input, shape index: {}]   ;;  %s564_s4 = inlined_call_operand.vmem [shape: f32[1,128], index: 4, kind: input, shape index: {}]   ;;  %s565_s5 = inlined_call_operand.hbm [shape: f32[8,16], index: 5, kind: output, shape index: {}]  }
   0x1   :  { %11 = vsyncpa [#allocation6], 0 }
   0x2   :  { %12 = vsyncpa [#allocation4], 0  ;;  %s461_s18 = smov [#allocation5]   ;;  %s367_s22 = scalar_lea.hbm %s561_s1, 512 }
   0x3   :  { %s28_s19 = sshll.u32 %s461_s18, 4  ;;  %p368_p0 = scmp.ne.s32.totalorder %s561_s1, %s367_s22  ;;  %s29_s19 = int_to_ptr.vmem [resolvable:$true] %s28_s19 }
   0x4   :  { %p371_p1 = scmp.lt.u32.totalorder %s367_s22, %s561_s1 }
   0x6   :  { %p373_p2 = pnand %p371_p1, %p368_p0 }
   0x8   :  { %376 = shalt.err (!%p373_p2)
}
   0x9   :  { %s377_s27 = scalar_lea.vmem %s29_s19, 512  ;;  %p382_p4 = scmp.lt.s32.totalorder %s29_s19, %s29_s19 }
   0xa   :  { %p378_p3 = scmp.ne.s32.totalorder %s29_s19, %s377_s27  ;;  %p383_p5 = scmp.lt.s32.totalorder %s377_s27, %s377_s27 }
   0xc   :  { %p384_p6 = por %p383_p5, %p382_p4 }
   0xe   :  { %p385_p7 = pnand %p384_p6, %p378_p3 }
  0x10   :  { %388 = shalt.err (!%p385_p7)
}
  0x11   :  { %s462_s28 = smov 128   ;;  %s463_s29 = smov 8  }
  0x12   :  { %34 = dma.hbm_to_vmem [thread:$0]  %s561_s1, 512, %s29_s19, [#allocation6], %s462_s28, %s462_s28, %s463_s29  }
  0x13   :  { %s464_s7 = smov [#allocation2]   ;;  %s465_s9 = smov [#allocation7]  }
  0x14   :  { %s19_s8 = sshll.u32 %s464_s7, 4  ;;  %s42_s10 = sshll.u32 %s465_s9, 4  ;;  %s20_s8 = int_to_ptr.vmem [resolvable:$true] %s19_s8  ;;  %s43_s10 = int_to_ptr.vmem [resolvable:$true] %s42_s10 }
  0x15   :  { %s389_s13 = scalar_lea.hbm %s560_s0, 128 }
  0x16   :  { %p390_p8 = scmp.ne.s32.totalorder %s560_s0, %s389_s13  ;;  %p393_p9 = scmp.lt.u32.totalorder %s389_s13, %s560_s0 }
  0x18   :  { %p395_p10 = pnand %p393_p9, %p390_p8 }
  0x1a   :  { %398 = shalt.err (!%p395_p10)
}
  0x1b   :  { %s399_s1 = scalar_lea.vmem %s20_s8, 128  ;;  %p404_p12 = scmp.lt.s32.totalorder %s20_s8, %s20_s8 }
  0x1c   :  { %p400_p11 = scmp.ne.s32.totalorder %s20_s8, %s399_s1  ;;  %p405_p13 = scmp.lt.s32.totalorder %s399_s1, %s399_s1 }
  0x1e   :  { %p406_p0 = por %p405_p13, %p404_p12 }
  0x20   :  { %p407_p1 = pnand %p406_p0, %p400_p11 }
  0x22   :  { %410 = shalt.err (!%p407_p1)
}
  0x23   :  { %22 = dma.hbm_to_vmem [thread:$0]  %s560_s0, 128, %s20_s8, [#allocation3]  }
  0x24   :  { %s411_s22 = scalar_lea.hbm %s563_s3, 2048 }
  0x25   :  { %p412_p2 = scmp.ne.s32.totalorder %s563_s3, %s411_s22  ;;  %p415_p3 = scmp.lt.u32.totalorder %s411_s22, %s563_s3 }
  0x27   :  { %p417_p4 = pnand %p415_p3, %p412_p2 }
  0x29   :  { %420 = shalt.err (!%p417_p4)
}
  0x2a   :  { %s421_s27 = scalar_lea.vmem %s43_s10, 2048  ;;  %p426_p6 = scmp.lt.s32.totalorder %s43_s10, %s43_s10 }
  0x2b   :  { %p422_p5 = scmp.ne.s32.totalorder %s43_s10, %s421_s27  ;;  %p427_p7 = scmp.lt.s32.totalorder %s421_s27, %s421_s27 }
  0x2d   :  { %p428_p8 = por %p427_p7, %p426_p6 }
  0x2f   :  { %p429_p9 = pnand %p428_p8, %p422_p5 }
  0x31   :  { %432 = shalt.err (!%p429_p9)
}
  0x32   :  { %48 = dma.hbm_to_vmem [thread:$0]  %s563_s3, 2048, %s43_s10, [#allocation6], %s462_s28, %s462_s28, %s463_s29  }
  0x33   :  { %455 = dma.done.wait [#allocation3], 128  }
  0x34   :  { %456 = vsyncadd [#allocation3], 4294967168 }
  0x35   :  { %457 = dma.done.wait [#allocation6], 2560  }
  0x36   :  { %458 = vsyncadd [#allocation6], 4294964736  ;;  %v466_v0 = vmov 0.0|0.0   ;;  %vm467_vm0 = vmmov 0   ;;  %v468_v1 = vmov 0.0   ;;  %v61_v2 = vld [vmem:[#allocation5] sm:$0xff] }
  0x37   :  { %328 = vmatprep.subr.bf16.mxu0 %v466_v0  ;;  %290 = vmatprep.mubr.msk.f32.mxu0 %vm467_vm0, %v468_v1  ;;  %v62_v3 = vld [vmem:[#allocation5 + $0x8] sm:$0xff]  ;;  %v63_v4 = vld [vmem:[#allocation5 + $0x10] sm:$0xff]  ;;  %v64_v6 = vld [vmem:[#allocation5 + $0x18] sm:$0xff]  ;;  %vm72_vm1 = vcmask 261120   ;;  %s469_s7 = smov [#allocation8]   ;;  %vm239_vm2 = vcmask 130048  }
  0x38   :  { %334 = vmatprep.subr.bf16.mxu1 %v466_v0  ;;  %325 = vmatprep.mubr.msk.f32.mxu1 %vm467_vm0, %v468_v1  ;;  %v329_v5 = vpack.c.bf16 %v62_v3, %v61_v2  ;;  %v146_v7 = vld [vmem:[#allocation7] sm:$0xff]  ;;  %v147_v8 = vld [vmem:[#allocation7 + $0x8] sm:$0xff]  ;;  %v148_v9 = vld [vmem:[#allocation7 + $0x10] sm:$0xff]  ;;  %v332_v11 = vpack.c.bf16 %v64_v6, %v63_v4  ;;  %s247_s8 = sshll.u32 %s469_s7, 4  ;;  %s248_s8 = int_to_ptr.vmem [resolvable:$true] %s247_s8 }
  0x39   :  { %v149_v10 = vld [vmem:[#allocation7 + $0x18] sm:$0xff]  ;;  %v335_v12 = vpack.c.bf16 %v147_v8, %v146_v7  ;;  %v150_v14 = vld [vmem:[#allocation7 + $0x20] sm:$0xff]  ;;  %v151_v15 = vld [vmem:[#allocation7 + $0x28] sm:$0xff]  ;;  %s433_s9 = scalar_lea.vmem %s248_s8, 128  ;;  %p438_p11 = scmp.lt.s32.totalorder %s248_s8, %s248_s8 }
  0x3a   :  { %330 = vmatpush3.bf16.msra.mxu0 %v329_v5  ;;  %v338_v13 = vpack.c.bf16 %v149_v10, %v148_v9  ;;  %v60_v16 = vld [vmem:[#allocation2] sm:$0xff]  ;;  %v341_v17 = vpack.c.bf16 %v151_v15, %v150_v14  ;;  %v152_v18 = vld [vmem:[#allocation7 + $0x30] sm:$0xff]  ;;  %v154_v21 = vld [vmem:[#allocation7 + $0x40] sm:$0xff]  ;;  %p434_p10 = scmp.ne.s32.totalorder %s248_s8, %s433_s9  ;;  %p439_p12 = scmp.lt.s32.totalorder %s433_s9, %s433_s9 }
  0x3b   :  { %331 = vmatprep.subr.bf16.mxu0 %v466_v0  ;;  %336 = vmatpush3.bf16.msra.mxu1 %v335_v12  ;;  %v153_v19 = vld [vmem:[#allocation7 + $0x38] sm:$0xff]  ;;  %v155_v22 = vld [vmem:[#allocation7 + $0x48] sm:$0xff]  ;;  %v156_v24 = vld [vmem:[#allocation7 + $0x50] sm:$0xff] }
  0x3c   :  { %337 = vmatprep.subr.bf16.mxu1 %v466_v0  ;;  %v344_v20 = vpack.c.bf16 %v153_v19, %v152_v18  ;;  %v347_v23 = vpack.c.bf16 %v155_v22, %v154_v21  ;;  %v157_v25 = vld [vmem:[#allocation7 + $0x58] sm:$0xff]  ;;  %v158_v27 = vld [vmem:[#allocation7 + $0x60] sm:$0xff]  ;;  %v159_v28 = vld [vmem:[#allocation7 + $0x68] sm:$0xff]  ;;  %p440_p13 = por %p439_p12, %p438_p11 }
  0x3d   :  { %v350_v26 = vpack.c.bf16 %v157_v25, %v156_v24  ;;  %v353_v29 = vpack.c.bf16 %v159_v28, %v158_v27  ;;  %v160_v30 = vld [vmem:[#allocation7 + $0x70] sm:$0xff]  ;;  %v161_v31 = vld [vmem:[#allocation7 + $0x78] sm:$0xff] }
  0x3e   :  { %333 = vmatpush3.bf16.msra.mxu0 %v332_v11  ;;  %v356_v32 = vpack.c.bf16 %v161_v31, %v160_v30  ;;  %v257_v33 = vld [vmem:[%s562_s2] ss:$0 sm:$0xff]  ;;  %p441_p0 = pnand %p440_p13, %p434_p10 }
  0x3f   :  { %339 = vmatpush3.bf16.msra.mxu1 %v338_v13  ;;  %v259_v37 = vld [vmem:[%s564_s4] ss:$0 sm:$0xff] }
  0x40   :  { %340 = vmatprep.subr.bf16.mxu1 %v466_v0 }
  0x41   :  { %291 = vmatmul.mubr.msk.f32.vlgmr.msra.gmra.mrb[0].mxu0 %vm72_vm1, %v60_v16 }
  0x43   :  { %342 = vmatpush3.bf16.msra.mxu1 %v341_v17 }
  0x44   :  { %343 = vmatprep.subr.bf16.mxu1 %v466_v0 }
  0x47   :  { %345 = vmatpush3.bf16.msra.mxu1 %v344_v20 }
  0x48   :  { %346 = vmatprep.subr.bf16.mxu1 %v466_v0 }
  0x4b   :  { %348 = vmatpush3.bf16.msra.mxu1 %v347_v23 }
  0x4c   :  { %349 = vmatprep.subr.bf16.mxu1 %v466_v0 }
  0x4f   :  { %351 = vmatpush3.bf16.msra.mxu1 %v350_v26 }
  0x50   :  { %352 = vmatprep.subr.bf16.mxu1 %v466_v0 }
  0x53   :  { %354 = vmatpush3.bf16.msra.mxu1 %v353_v29 }
  0x54   :  { %355 = vmatprep.subr.bf16.mxu1 %v466_v0 }
  0x57   :  { %357 = vmatpush3.bf16.msra.mxu1 %v356_v32 }
 0x114   :  { %v142_v34 = vpop.f32.mrb[0].mxu0 }
 0x115   :  { %v143_v35 = vadd.f32 %v257_v33, %v142_v34  ;;  %v292_v36 = vpop.f32.mrb[1].mxu0 }
 0x117   :  { %326 = vmatmul.mubr.f32.vlgmr.msra.gmra.mrb[0].mxu1 %v143_v35 }
 0x1ea   :  { %v235_v38 = vpop.f32.mrb[0].mxu1 }
 0x1eb   :  { %v236_v39 = vadd.f32 %v259_v37, %v235_v38  ;;  %v327_v40 = vpop.f32.mrb[1].mxu1 }
 0x1ed   :  { %240 = vst.msk [vmem:[#allocation8] sm:$0xff] %vm239_vm2, %v236_v39 }
 0x1ee   :  { %444 = shalt.err (!%p441_p0)
}
 0x1ef   :  { %s445_s11 = scalar_lea.hbm %s565_s5, 128 }
 0x1f0   :  { %p446_p1 = scmp.ne.s32.totalorder %s565_s5, %s445_s11  ;;  %p449_p2 = scmp.lt.u32.totalorder %s445_s11, %s565_s5 }
 0x1f2   :  { %p451_p3 = pnand %p449_p2, %p446_p1 }
 0x1f4   :  { %454 = shalt.err (!%p451_p3)
}
 0x1f5   :  { %250 = dma.vmem_to_hbm [thread:$0]  %s248_s8, 128, %s565_s5, [#allocation4]  }
 0x1f6   :  { %459 = dma.done.wait [#allocation4], 128  }
 0x1f7   :  { %460 = vsyncadd [#allocation4], 4294967168 }
 0x1f8   :  { %254 = vsyncpa [#allocation3], 1 }
 0x1f9   :  { %255 = vsyncpa [#allocation6], 1 }
 0x1fa   :  { %256 = vsyncpa [#allocation4], 1 }

</bundles_post_ra>
